<compile_context>
chip_gen: v7x
topology: tpu7x:2x2x1
jax: 0.10.0
libtpu: 0.0.40
codegen_flags: <defaults>
</compile_context>

<pallas_src>
import jax
import jax.numpy as jnp
from jax.experimental import pallas as pl
from jax.experimental.pallas import tpu as pltpu


# ----------------------------- Pallas kernels ------------------------------

def rgcn_msg_kernel(x_ref, wrelcat_ref, msg_ref):
    """Per-edge-type messages, computed as ONE lane-stacked MXU call.

    x_ref      : (tile_N, Cin)          bf16 node features (row tile)
    wrelcat_ref: (Cin, E_t*Cout)        bf16 rel_lins weights, lane-stacked
    msg_ref    : (E_t, tile_N, Cout)    bf16 messages, row-stacked per edge type
    """
    m = jnp.dot(x_ref[...], wrelcat_ref[...],
                preferred_element_type=jnp.float32)        # (tile_N, E_t*Cout)
    num_et, _, c_out = msg_ref.shape
    for t in range(num_et):
        msg_ref[t] = m[:, t * c_out:(t + 1) * c_out].astype(msg_ref.dtype)


def _make_rgcn_conv_kernel(mode):
    """mode in {"relu", "pre_relu", "logits_logsoftmax"} (compile-time)."""

    def kernel(acat_ref, msg_ref, xaug_ref, wraug_ref, *out_refs):
        # Relation path: single MXU call, fused contraction over all edge types.
        #   acat (tile_N, E_t*N) @ msg (E_t*N, Cout)
        acc = jnp.dot(acat_ref[...], msg_ref[...],
                      preferred_element_type=jnp.float32)
        # Root path + bias: single MXU call.
        #   [mask*x | mask] (tile_N, K*Cin+K) @ [Wroot_rows ; broot] (K*Cin+K, Cout)
        acc = acc + jnp.dot(xaug_ref[...], wraug_ref[...],
                            preferred_element_type=jnp.float32)

        if mode == "relu":                       # hidden (non-penultimate) layer
            out_refs[0][...] = jnp.maximum(acc, 0.0)
        elif mode == "pre_relu":                 # penultimate layer: need both
            out_refs[0][...] = acc
            out_refs[1][...] = jnp.maximum(acc, 0.0)
        else:                                    # last layer: logits + log_softmax
            out_refs[0][...] = acc
            mx = jnp.max(acc, axis=-1, keepdims=True)
            s = acc - mx
            lse = jnp.log(jnp.sum(jnp.exp(s), axis=-1, keepdims=True))
            out_refs[1][...] = s - lse

    return kernel


# ------------------------------ wrappers ------------------------------------

def _round_up(v, m):
    return ((v + m - 1) // m) * m


def _pick_tile(n, num_edge_types):
    """Row-tile size for destination nodes + padded node count."""
    tile = min(256, _round_up(n, 8))
    n_pad = _round_up(n, tile)
    # keep the double-buffered bf16 A row tile under ~24 MiB (v7x-safe budget)
    while tile > 8 and 2 * tile * num_edge_types * n_pad * 2 > 24 * 1024 * 1024:
        tile //= 2
    return tile, n_pad


def rgcn_messages(x_bf16, wrel_cat, num_edge_types, tile_n):
    """One lane-stacked matmul -> row-stacked messages (E_t*N, Cout), bf16."""
    n_pad, c_in = x_bf16.shape
    c_out = wrel_cat.shape[1] // num_edge_types
    msg = pl.pallas_call(
        rgcn_msg_kernel,
        out_shape=jax.ShapeDtypeStruct((num_edge_types, n_pad, c_out),
                                       jnp.bfloat16),
        grid_spec=pltpu.PrefetchScalarGridSpec(
            num_scalar_prefetch=0,
            grid=(n_pad // tile_n,),
            in_specs=[
                pl.BlockSpec((tile_n, c_in), lambda i: (i, 0)),
                pl.BlockSpec(wrel_cat.shape, lambda i: (0, 0)),   # resident
            ],
            out_specs=pl.BlockSpec((num_edge_types, tile_n, c_out),
                                   lambda i: (0, i, 0)),
        ),
        compiler_params=pltpu.CompilerParams(
            dimension_semantics=("parallel",)),
    )(x_bf16, wrel_cat)
    return msg.reshape(num_edge_types * n_pad, c_out)   # free metadata reshape


def rgcn_conv(a_cat, msg_stacked, x_aug, wroot_aug, *, mode, tile_n):
    """One RGCNConv layer over destination-row tiles (pipelined, parallel)."""
    n_pad = a_cat.shape[0]
    c_out = wroot_aug.shape[1]
    out_struct = jax.ShapeDtypeStruct((n_pad, c_out), jnp.float32)
    out_block = pl.BlockSpec((tile_n, c_out), lambda i: (i, 0))

    if mode == "relu":
        out_shape, out_specs = out_struct, out_block
    else:
        out_shape = (out_struct, out_struct)
        out_specs = (out_block, pl.BlockSpec((tile_n, c_out), lambda i: (i, 0)))

    return pl.pallas_call(
        _make_rgcn_conv_kernel(mode),
        out_shape=out_shape,
        grid_spec=pltpu.PrefetchScalarGridSpec(
            num_scalar_prefetch=0,
            grid=(n_pad // tile_n,),
            in_specs=[
                # dominant operand: adjacency row tile, pipelined/double-buffered
                pl.BlockSpec((tile_n, a_cat.shape[1]), lambda i: (i, 0)),
                pl.BlockSpec(msg_stacked.shape, lambda i: (0, 0)),  # resident
                pl.BlockSpec((tile_n, x_aug.shape[1]), lambda i: (i, 0)),
                pl.BlockSpec(wroot_aug.shape, lambda i: (0, 0)),    # resident
            ],
            out_specs=out_specs,
        ),
        compiler_params=pltpu.CompilerParams(
            dimension_semantics=("parallel",),        # 2 TCs on v7x
            vmem_limit_bytes=48 * 1024 * 1024,
        ),
    )(a_cat, msg_stacked, x_aug, wroot_aug)


# ------------------------------ model glue ----------------------------------

def init_params(key, in_c, hid_c, out_c, num_layers, num_node_types,
                num_edge_types, num_nodes_dict, x_types):
    def xavier(k, shape, fan_in, fan_out):
        lim = (6.0 / (fan_in + fan_out)) ** 0.5
        return jax.random.uniform(k, shape, jnp.float32, -lim, lim)

    layer_dims = ([(in_c, hid_c)] + [(hid_c, hid_c)] * (num_layers - 2)
                  + [(hid_c, out_c)])
    convs = []
    for (cin, cout) in layer_dims:
        key, k1, k2, k3 = jax.random.split(key, 4)
        convs.append({
            'wrel':  xavier(k1, (num_edge_types, cin, cout), cin, cout),
            'wroot': xavier(k2, (num_node_types, cin, cout), cin, cout),
            'broot': jax.random.uniform(k3, (num_node_types, cout),
                                        jnp.float32, -0.1, 0.1),
        })
    emb = {}
    for nt in sorted(set(range(num_node_types)) - set(x_types)):
        key, ke = jax.random.split(key)
        emb[nt] = xavier(ke, (num_nodes_dict[nt], in_c),
                         num_nodes_dict[nt], in_c)
    return {'convs': convs, 'emb': emb}


def group_input(x_dict, emb_dict, node_type, local_node_idx, in_channels):
    n = node_type.shape[0]
    h = jnp.zeros((n, in_channels), jnp.float32)
    for key, feats in {**x_dict, **emb_dict}.items():
        mask = (node_type == key)
        idx = jnp.clip(local_node_idx, 0, feats.shape[0] - 1)
        h = jnp.where(mask[:, None], feats[idx], h)
    return h


def build_mean_adjacency_cat(edge_index, edge_type, num_edge_types, n_pad):
    """Per-edge-type scatter-mean as dense normalized A_t, lane-concatenated:
    a_cat[m, t*n_pad + n] = A_t[m, n]  (matches the row-stacked message layout)."""
    src, dst = edge_index[0], edge_index[1]
    blocks = []
    for t in range(num_edge_types):
        w = (edge_type == t).astype(jnp.float32)
        a = jnp.zeros((n_pad, n_pad), jnp.float32).at[dst, src].add(w)
        deg = a.sum(axis=1, keepdims=True)
        blocks.append(a / jnp.maximum(deg, 1.0))         # scatter-mean
    return jnp.concatenate(blocks, axis=1).astype(jnp.bfloat16)


def rgcn_forward(params, x_dict, edge_index, edge_type, node_type,
                 local_node_idx, *, in_channels, num_node_types,
                 num_edge_types, num_layers):
    n = node_type.shape[0]
    tile_n, n_pad = _pick_tile(n, num_edge_types)
    pad = n_pad - n

    x = group_input(x_dict, params['emb'], node_type, local_node_idx,
                    in_channels)
    x = jnp.pad(x, ((0, pad), (0, 0)))
    node_type_p = jnp.pad(node_type, (0, pad), constant_values=num_node_types)
    # padded rows -> all-zero one-hot -> zero root/bias contribution
    type_mask = jax.nn.one_hot(node_type_p, num_node_types, dtype=jnp.float32)
    a_cat = build_mean_adjacency_cat(edge_index, edge_type, num_edge_types,
                                     n_pad)

    num_l = len(params['convs'])
    out_save, g, log_probs = None, None, None
    for i, layer in enumerate(params['convs']):
        g = x
        c_in = layer['wrel'].shape[1]
        c_out = layer['wrel'].shape[2]

        # ---- relation path operands (lane-stacked) ----
        wrel_cat = jnp.transpose(layer['wrel'], (1, 0, 2)).reshape(
            c_in, num_edge_types * c_out).astype(jnp.bfloat16)
        msg_stacked = rgcn_messages(x.astype(jnp.bfloat16), wrel_cat,
                                    num_edge_types, tile_n)

        # ---- root path operands: fold K linears + biases into one matmul ----
        x_masked = (type_mask[:, :, None] * x[:, None, :]).reshape(
            n_pad, num_node_types * c_in)
        x_aug = jnp.concatenate([x_masked, type_mask], axis=1).astype(
            jnp.bfloat16)
        wroot_aug = jnp.concatenate(
            [layer['wroot'].reshape(num_node_types * c_in, c_out),
             layer['broot']], axis=0).astype(jnp.bfloat16)

        if i == num_l - 1:
            # last layer: logits + fused log_softmax (no extra kernel launch)
            logits, log_probs = rgcn_conv(a_cat, msg_stacked, x_aug, wroot_aug,
                                          mode="logits_logsoftmax",
                                          tile_n=tile_n)
            x = logits
        elif i == num_l - 2:
            # penultimate layer: pre-activation (returned as `out`) + relu
            pre, act = rgcn_conv(a_cat, msg_stacked, x_aug, wroot_aug,
                                 mode="pre_relu", tile_n=tile_n)
            out_save = pre
            # TODO(synk): F.dropout(p=0.5) modeled in eval mode (identity).
            x = act
        else:
            # earlier layers: only the relu output is ever consumed
            x = rgcn_conv(a_cat, msg_stacked, x_aug, wroot_aug,
                          mode="relu", tile_n=tile_n)
            # TODO(synk): F.dropout(p=0.5) modeled in eval mode (identity).

    return log_probs[:n], out_save[:n], g[:n], x[:n]


# --------------------------------- main --------------------------------------

if __name__ == "__main__":
    key = jax.random.PRNGKey(0)

    in_c, hid_c, out_c = 16, 32, 8
    num_layers = 3
    num_node_types = 3
    num_edge_types = 4
    x_types = [0, 1]                         # node types with input features
    num_nodes_dict = {0: 40, 1: 30, 2: 20}   # type 2 gets a learned embedding
    N, E = 64, 256

    keys = jax.random.split(key, 8)
    x_dict = {
        0: jax.random.normal(keys[0], (num_nodes_dict[0], in_c), jnp.float32),
        1: jax.random.normal(keys[1], (num_nodes_dict[1], in_c), jnp.float32),
    }
    node_type = jax.random.randint(keys[2], (N,), 0, num_node_types)
    counts = jnp.array([num_nodes_dict[k] for k in range(num_node_types)],
                       jnp.int32)
    local_node_idx = (jax.random.randint(keys[3], (N,), 0, 1 << 30)
                      % counts[node_type])
    edge_index = jax.random.randint(keys[4], (2, E), 0, N)
    edge_type = jax.random.randint(keys[5], (E,), 0, num_edge_types)

    params = init_params(keys[6], in_c, hid_c, out_c, num_layers,
                         num_node_types, num_edge_types, num_nodes_dict,
                         x_types)

    log_probs, out_pre, g_last, x_final = rgcn_forward(
        params, x_dict, edge_index, edge_type, node_type, local_node_idx,
        in_channels=in_c, num_node_types=num_node_types,
        num_edge_types=num_edge_types, num_layers=num_layers)

    jax.block_until_ready((log_probs, out_pre, g_last, x_final))
    assert log_probs.shape == (N, out_c)
    assert out_pre.shape == (N, hid_c)
    assert g_last.shape == (N, hid_c)
    assert x_final.shape == (N, out_c)
    assert bool(jnp.all(jnp.isfinite(log_probs)))
    assert bool(jnp.all(jnp.isfinite(x_final)))
    # log_softmax rows must exponentiate-sum to 1 (fused epilogue sanity check)
    row_sums = jnp.sum(jnp.exp(log_probs), axis=-1)
    assert bool(jnp.all(jnp.abs(row_sums - 1.0) < 1e-3))
    print("KERNEL_OK")
</pallas_src>

<mosaic_0001>
module attributes {stable_mosaic.version = 11 : i64} {
  func.func @rgcn_msg_kernel(%arg0: i32, %arg1: memref<64x16xbf16, #tpu.memory_space<vmem>>, %arg2: memref<16x128xbf16, #tpu.memory_space<vmem>>, %arg3: memref<4x64x32xbf16, #tpu.memory_space<vmem>>) attributes {dimension_semantics = [#tpu.dimension_semantics<parallel>], iteration_bounds = array<i64: 1>, scalar_prefetch = 0 : i64, scratch_operands = 0 : i64, tpu.core_type = #tpu.core_type<tc>, window_params = [{transform_indices = @transform_0, window_bounds = array<i64: 64, 16>}, {pipeline_mode = #tpu.pipeline_mode<synchronous>, transform_indices = @transform_1, window_bounds = array<i64: 16, 128>}, {transform_indices = @transform_2, window_bounds = array<i64: 4, 64, 32>}]} {
    %c0 = arith.constant 0 : index
    %c0_0 = arith.constant 0 : index
    %0 = vector.load %arg1[%c0, %c0_0] : memref<64x16xbf16, #tpu.memory_space<vmem>>, vector<64x16xbf16>
    %c0_1 = arith.constant 0 : index
    %c0_2 = arith.constant 0 : index
    %1 = vector.load %arg2[%c0_1, %c0_2] : memref<16x128xbf16, #tpu.memory_space<vmem>>, vector<16x128xbf16>
    %cst = arith.constant dense<0.000000e+00> : vector<64x128xf32>
    %2 = tpu.matmul %0, %1, %cst {dimension_numbers = #tpu.dot_dimension_numbers<[1], [0], [0], [1], [0, 0, 1, 1], [], []>} : vector<64x16xbf16>, vector<16x128xbf16>, vector<64x128xf32> -> vector<64x128xf32>
    %3 = vector.extract_strided_slice %2 {offsets = [0, 0], sizes = [64, 32], strides = [1, 1]} : vector<64x128xf32> to vector<64x32xf32>
    %4 = arith.truncf %3 : vector<64x32xf32> to vector<64x32xbf16>
    %c0_3 = arith.constant 0 : index
    %c0_4 = arith.constant 0 : index
    %c0_5 = arith.constant 0 : index
    %5 = vector.load %arg3[%c0_3, %c0_4, %c0_5] : memref<4x64x32xbf16, #tpu.memory_space<vmem>>, vector<1x64x32xbf16>
    %6 = vector.shape_cast %5 : vector<1x64x32xbf16> to vector<64x32xbf16>
    %7 = vector.shape_cast %4 : vector<64x32xbf16> to vector<1x64x32xbf16>
    tpu.vector_store %arg3[%c0_3, %c0_4, %c0_5], %7 {strides = array<i32>} : memref<4x64x32xbf16, #tpu.memory_space<vmem>>, vector<1x64x32xbf16>,
    %8 = vector.extract_strided_slice %2 {offsets = [0, 32], sizes = [64, 32], strides = [1, 1]} : vector<64x128xf32> to vector<64x32xf32>
    %9 = arith.truncf %8 : vector<64x32xf32> to vector<64x32xbf16>
    %c1 = arith.constant 1 : index
    %c0_6 = arith.constant 0 : index
    %c0_7 = arith.constant 0 : index
    %10 = vector.load %arg3[%c1, %c0_6, %c0_7] : memref<4x64x32xbf16, #tpu.memory_space<vmem>>, vector<1x64x32xbf16>
    %11 = vector.shape_cast %10 : vector<1x64x32xbf16> to vector<64x32xbf16>
    %12 = vector.shape_cast %9 : vector<64x32xbf16> to vector<1x64x32xbf16>
    tpu.vector_store %arg3[%c1, %c0_6, %c0_7], %12 {strides = array<i32>} : memref<4x64x32xbf16, #tpu.memory_space<vmem>>, vector<1x64x32xbf16>,
    %13 = vector.extract_strided_slice %2 {offsets = [0, 64], sizes = [64, 32], strides = [1, 1]} : vector<64x128xf32> to vector<64x32xf32>
    %14 = arith.truncf %13 : vector<64x32xf32> to vector<64x32xbf16>
    %c2 = arith.constant 2 : index
    %c0_8 = arith.constant 0 : index
    %c0_9 = arith.constant 0 : index
    %15 = vector.load %arg3[%c2, %c0_8, %c0_9] : memref<4x64x32xbf16, #tpu.memory_space<vmem>>, vector<1x64x32xbf16>
    %16 = vector.shape_cast %15 : vector<1x64x32xbf16> to vector<64x32xbf16>
    %17 = vector.shape_cast %14 : vector<64x32xbf16> to vector<1x64x32xbf16>
    tpu.vector_store %arg3[%c2, %c0_8, %c0_9], %17 {strides = array<i32>} : memref<4x64x32xbf16, #tpu.memory_space<vmem>>, vector<1x64x32xbf16>,
    %18 = vector.extract_strided_slice %2 {offsets = [0, 96], sizes = [64, 32], strides = [1, 1]} : vector<64x128xf32> to vector<64x32xf32>
    %19 = arith.truncf %18 : vector<64x32xf32> to vector<64x32xbf16>
    %c3 = arith.constant 3 : index
    %c0_10 = arith.constant 0 : index
    %c0_11 = arith.constant 0 : index
    %20 = vector.load %arg3[%c3, %c0_10, %c0_11] : memref<4x64x32xbf16, #tpu.memory_space<vmem>>, vector<1x64x32xbf16>
    %21 = vector.shape_cast %20 : vector<1x64x32xbf16> to vector<64x32xbf16>
    %22 = vector.shape_cast %19 : vector<64x32xbf16> to vector<1x64x32xbf16>
    tpu.vector_store %arg3[%c3, %c0_10, %c0_11], %22 {strides = array<i32>} : memref<4x64x32xbf16, #tpu.memory_space<vmem>>, vector<1x64x32xbf16>,
    return
  }
  func.func @transform_0(%arg0: i32) -> (i32, i32) {
    %c0_i32 = arith.constant 0 : i32
    %c0_i32_0 = arith.constant 0 : i32
    return %arg0, %c0_i32 : i32, i32
  }
  func.func @transform_1(%arg0: i32) -> (i32, i32) {
    %c0_i32 = arith.constant 0 : i32
    %c0_i32_0 = arith.constant 0 : i32
    %c0_i32_1 = arith.constant 0 : i32
    return %c0_i32, %c0_i32_0 : i32, i32
  }
  func.func @transform_2(%arg0: i32) -> (i32, i32, i32) {
    %c0_i32 = arith.constant 0 : i32
    %c0_i32_0 = arith.constant 0 : i32
    %c0_i32_1 = arith.constant 0 : i32
    return %c0_i32, %arg0, %c0_i32_0 : i32, i32, i32
  }
}

</mosaic_0001>

<bundles_post_ra>
// kernel: tpu_custom_call.1
= control target key start
LH: loop header
LB: loop body
LE: loop exit
PB: predicated region body
PF: predicated region fallthrough
CT: control target
= control target key end

     0   :  { %vm48_vm0 = vcmask 130048   ;;  %vm158_vm1 = vcmask 257024   ;;  %s344_s21 = smov 96   ;;  %s345_s6 = smov 64   ;;  %s513_s1 = inlined_call_operand.vmem [shape: bf16[16,128], index: 1, kind: input, shape index: {}]   ;;  %s514_s0 = inlined_call_operand.vmem [shape: bf16[64,16], index: 0, kind: input, shape index: {}]   ;;  %s515_s2 = inlined_call_operand.vmem [shape: bf16[4,64,32], index: 2, kind: output, shape index: {}]  }
   0x1   :  { %v339_v0 = vld [vmem:[%s513_s1] sm:$0xff]   ;;  %v341_v2 = vld [vmem:[%s514_s0 + $0x10] sm:$0xff]   ;;  %v342_v3 = vld [vmem:[%s514_s0 + $0x8] sm:$0xff]   ;;  %s346_s7 = smov 32  }
   0x2   :  { %v340_v1 = vld [vmem:[%s514_s0] sm:$0xff]   ;;  %324 = vmatprep.subr.bf16.mxu0 %v339_v0  ;;  %334 = vmatprep.subr.bf16.mxu1 %v339_v0  ;;  %v343_v4 = vld [vmem:[%s514_s0 + $0x18] sm:$0xff]  }
   0x3   :  { %325 = vmatpush3.bf16.msra.mxu0 %v339_v0  ;;  %335 = vmatpush3.bf16.msra.mxu1 %v339_v0 }
   0x4   :  { %326 = vmatprep.mubr.msk.bf16.mxu0 %vm48_vm0, %v340_v1  ;;  %330 = vmatprep.mubr.msk.bf16.mxu1 %vm48_vm0, %v341_v2 }
   0x6   :  { %327 = vmatmul.mubr.msk.bf16.vlgmr.msra.gmra.mrb[0].mxu0 %vm48_vm0, %v342_v3  ;;  %331 = vmatmul.mubr.msk.bf16.vlgmr.msra.gmra.mrb[0].mxu1 %vm48_vm0, %v343_v4 }
  0xd9   :  { %v328_v5 = vpop.f32.mrb[0].mxu0  ;;  %v332_v6 = vpop.f32.mrb[0].mxu1 }
  0xda   :  { %v313_v7 = vpack.c.bf16 %v328_v5, %v328_v5  ;;  %v317_v8 = vpack.c.bf16 %v332_v6, %v332_v6  ;;  %v95_v9 = vpop.f32.mrb[1].mxu0  ;;  %v111_v10 = vpop.f32.mrb[1].mxu1 }
  0xdb   :  { %v311_v11 = vpack.c.bf16 %v95_v9, %v95_v9  ;;  %v315_v12 = vpack.c.bf16 %v111_v10, %v111_v10  ;;  %v329_v13 = vpop.f32.mrb[2].mxu0  ;;  %v333_v14 = vpop.f32.mrb[2].mxu1 }
  0xdc   :  { %161 = vst.msk [vmem:[%s515_s2 + $0x8] sm:$0xf] %vm158_vm1, %v313_v7  ;;  %165 = vst.msk [vmem:[%s515_s2 + $0x18] sm:$0xf] %vm158_vm1, %v317_v8  ;;  %v314_v15 = vpack.c.bf16 %v329_v13, %v329_v13  ;;  %v318_v16 = vpack.c.bf16 %v333_v14, %v333_v14  ;;  %179 = vrot.lane.b32.xlu0 %v317_v8, %s344_s21  ;;  %v114_v17 = vpop.f32.mrb[3].mxu1  ;;  %171 = vrot.lane.b32.xlu1 %v313_v7, %s344_s21  ;;  %v98_v18 = vpop.f32.mrb[3].mxu0 }
  0xdd   :  { %159 = vst.msk [vmem:[%s515_s2] sm:$0xf] %vm158_vm1, %v311_v11  ;;  %163 = vst.msk [vmem:[%s515_s2 + $0x10] sm:$0xf] %vm158_vm1, %v315_v12  ;;  %v316_v19 = vpack.c.bf16 %v114_v17, %v114_v17  ;;  %v312_v20 = vpack.c.bf16 %v98_v18, %v98_v18 }
  0xde   :  { %162 = vst.msk [vmem:[%s515_s2 + $0xc] sm:$0xf] %vm158_vm1, %v314_v15  ;;  %166 = vst.msk [vmem:[%s515_s2 + $0x1c] sm:$0xf] %vm158_vm1, %v318_v16 }
  0xdf   :  { %164 = vst.msk [vmem:[%s515_s2 + $0x14] sm:$0xf] %vm158_vm1, %v316_v19  ;;  %160 = vst.msk [vmem:[%s515_s2 + $0x4] sm:$0xf] %vm158_vm1, %v312_v20 }
  0xe0   :  { %204 = vrot.lane.b32.xlu0 %v313_v7, %s345_s6  ;;  %173 = vrot.lane.b32.xlu1 %v314_v15, %s344_s21 }
  0xe4   :  { %212 = vrot.lane.b32.xlu0 %v317_v8, %s345_s6  ;;  %181 = vrot.lane.b32.xlu1 %v318_v16, %s344_s21 }
  0xe8   :  { %237 = vrot.lane.b32.xlu0 %v313_v7, %s346_s7  ;;  %206 = vrot.lane.b32.xlu1 %v314_v15, %s345_s6 }
  0xec   :  { %167 = vrot.lane.b32.xlu0 %v311_v11, %s344_s21  ;;  %214 = vrot.lane.b32.xlu1 %v318_v16, %s345_s6 }
  0xf0   :  { %175 = vrot.lane.b32.xlu0 %v315_v12, %s344_s21  ;;  %239 = vrot.lane.b32.xlu1 %v314_v15, %s346_s7 }
  0xf4   :  { %200 = vrot.lane.b32.xlu0 %v311_v11, %s345_s6  ;;  %177 = vrot.lane.b32.xlu1 %v316_v19, %s344_s21 }
  0xf8   :  { %208 = vrot.lane.b32.xlu0 %v315_v12, %s345_s6  ;;  %202 = vrot.lane.b32.xlu1 %v312_v20, %s345_s6 }
  0xfc   :  { %233 = vrot.lane.b32.xlu0 %v311_v11, %s346_s7  ;;  %210 = vrot.lane.b32.xlu1 %v316_v19, %s345_s6 }
 0x100   :  { %241 = vrot.lane.b32.xlu0 %v315_v12, %s346_s7  ;;  %235 = vrot.lane.b32.xlu1 %v312_v20, %s346_s7 }
 0x104   :  { %243 = vrot.lane.b32.xlu1 %v316_v19, %s346_s7  ;;  %169 = vrot.lane.b32.xlu0 %v312_v20, %s344_s21 }
 0x108   :  { %247 = vrot.lane.b32.xlu1 %v318_v16, %s346_s7  ;;  %245 = vrot.lane.b32.xlu0 %v317_v8, %s346_s7 }
 0x14e   :  { %v180_v21 = vpop.permute.xlu0 %179  ;;  %v172_v22 = vpop.permute.xlu1 %171 }
 0x14f   :  { %293 = vst.msk [vmem:[%s515_s2 + $0x38] sm:$0xf] %vm158_vm1, %v180_v21  ;;  %289 = vst.msk [vmem:[%s515_s2 + $0x28] sm:$0xf] %vm158_vm1, %v172_v22 }
 0x152   :  { %v205_v23 = vpop.permute.xlu0 %204  ;;  %v174_v24 = vpop.permute.xlu1 %173 }
 0x153   :  { %297 = vst.msk [vmem:[%s515_s2 + $0x48] sm:$0xf] %vm158_vm1, %v205_v23  ;;  %290 = vst.msk [vmem:[%s515_s2 + $0x2c] sm:$0xf] %vm158_vm1, %v174_v24 }
 0x156   :  { %v213_v25 = vpop.permute.xlu0 %212  ;;  %v182_v26 = vpop.permute.xlu1 %181 }
 0x157   :  { %301 = vst.msk [vmem:[%s515_s2 + $0x58] sm:$0xf] %vm158_vm1, %v213_v25  ;;  %294 = vst.msk [vmem:[%s515_s2 + $0x3c] sm:$0xf] %vm158_vm1, %v182_v26 }
 0x15a   :  { %v238_v27 = vpop.permute.xlu0 %237  ;;  %v207_v28 = vpop.permute.xlu1 %206 }
 0x15b   :  { %305 = vst.msk [vmem:[%s515_s2 + $0x68] sm:$0xf] %vm158_vm1, %v238_v27  ;;  %298 = vst.msk [vmem:[%s515_s2 + $0x4c] sm:$0xf] %vm158_vm1, %v207_v28 }
 0x15e   :  { %v168_v29 = vpop.permute.xlu0 %167  ;;  %v215_v30 = vpop.permute.xlu1 %214 }
 0x15f   :  { %287 = vst.msk [vmem:[%s515_s2 + $0x20] sm:$0xf] %vm158_vm1, %v168_v29  ;;  %302 = vst.msk [vmem:[%s515_s2 + $0x5c] sm:$0xf] %vm158_vm1, %v215_v30 }
 0x162   :  { %v176_v31 = vpop.permute.xlu0 %175  ;;  %v240_v32 = vpop.permute.xlu1 %239 }
 0x163   :  { %291 = vst.msk [vmem:[%s515_s2 + $0x30] sm:$0xf] %vm158_vm1, %v176_v31  ;;  %306 = vst.msk [vmem:[%s515_s2 + $0x6c] sm:$0xf] %vm158_vm1, %v240_v32 }
 0x166   :  { %v201_v33 = vpop.permute.xlu0 %200  ;;  %v178_v34 = vpop.permute.xlu1 %177 }
 0x167   :  { %295 = vst.msk [vmem:[%s515_s2 + $0x40] sm:$0xf] %vm158_vm1, %v201_v33  ;;  %292 = vst.msk [vmem:[%s515_s2 + $0x34] sm:$0xf] %vm158_vm1, %v178_v34 }
 0x16a   :  { %v209_v35 = vpop.permute.xlu0 %208  ;;  %v203_v36 = vpop.permute.xlu1 %202 }
 0x16b   :  { %299 = vst.msk [vmem:[%s515_s2 + $0x50] sm:$0xf] %vm158_vm1, %v209_v35  ;;  %296 = vst.msk [vmem:[%s515_s2 + $0x44] sm:$0xf] %vm158_vm1, %v203_v36 }
 0x16e   :  { %v234_v37 = vpop.permute.xlu0 %233  ;;  %v211_v38 = vpop.permute.xlu1 %210 }
 0x16f   :  { %303 = vst.msk [vmem:[%s515_s2 + $0x60] sm:$0xf] %vm158_vm1, %v234_v37  ;;  %300 = vst.msk [vmem:[%s515_s2 + $0x54] sm:$0xf] %vm158_vm1, %v211_v38 }
 0x172   :  { %v242_v39 = vpop.permute.xlu0 %241  ;;  %v236_v40 = vpop.permute.xlu1 %235 }
 0x173   :  { %307 = vst.msk [vmem:[%s515_s2 + $0x70] sm:$0xf] %vm158_vm1, %v242_v39  ;;  %304 = vst.msk [vmem:[%s515_s2 + $0x64] sm:$0xf] %vm158_vm1, %v236_v40 }
 0x176   :  { %v244_v41 = vpop.permute.xlu1 %243  ;;  %v170_v42 = vpop.permute.xlu0 %169 }
 0x177   :  { %308 = vst.msk [vmem:[%s515_s2 + $0x74] sm:$0xf] %vm158_vm1, %v244_v41  ;;  %288 = vst.msk [vmem:[%s515_s2 + $0x24] sm:$0xf] %vm158_vm1, %v170_v42 }
 0x17a   :  { %v248_v43 = vpop.permute.xlu1 %247  ;;  %v246_v44 = vpop.permute.xlu0 %245 }
 0x17b   :  { %310 = vst.msk [vmem:[%s515_s2 + $0x7c] sm:$0xf] %vm158_vm1, %v248_v43  ;;  %309 = vst.msk [vmem:[%s515_s2 + $0x78] sm:$0xf] %vm158_vm1, %v246_v44 }

</bundles_post_ra>
